<compile_context>
chip_gen: v5e
topology: v5e:2x2
jax: 0.10.0
libtpu: 0.0.40
codegen_flags: <defaults>
</compile_context>

<pallas_src>
import functools

import jax
import jax.numpy as jnp
from jax.experimental import pallas as pl
from jax.experimental.pallas import tpu as pltpu

_LANE = 128         # lane width: last dims padded to multiples of this
_BF16_SUBLANE = 16  # bf16 vregs pack [16, 128]; batch tiles rounded to this
_MAX_TB = 256       # batch-tile cap (v6e-friendly)
_MAX_TK = 2048      # reduction-chunk cap when the weight cannot be resident


def _round_up(x, m):
    return (x + m - 1) // m * m


def _vmem_budget_bytes():
    """~Half of physical VMEM: ~32 MiB on v7x (64 MiB), ~64 MiB on v5e/v6e."""
    cap = 64 * 2**20
    try:
        cap = int(getattr(pltpu.get_tpu_info(), "vmem_capacity_bytes", cap))
    except Exception:
        pass
    return max(16 * 2**20, min(cap // 2, 64 * 2**20))


def _tile_usage_bytes(tb, tk, dp, kp):
    """Conservative VMEM footprint (every operand counted double-buffered)."""
    return (2 * tb * tk * 2        # x tile, bf16
            + 2 * tk * dp * 2      # fused pool weight, bf16
            + 2 * dp * kp * 2      # head weight, bf16
            + 2 * (dp + kp) * 4    # biases, f32
            + 2 * tb * kp * 4      # output tile, f32
            + tb * dp * 4)         # f32 accumulator scratch (multi-k only)


def _choose_tiles(bg, chw, dp, kp, budget):
    """Pick (tb, bp, tk, kdim); kdim is the zero-padded contraction length."""
    # bf16-sublane-aligned batch tile; >= 2 tiles when the batch allows so the
    # "parallel" axis can shard across v7x's two TensorCores.
    if bg <= _BF16_SUBLANE:
        tb = _BF16_SUBLANE
    else:
        tb = min(_MAX_TB, _round_up((bg + 1) // 2, _BF16_SUBLANE))
    bp = _round_up(bg, tb)

    chw_lane = _round_up(chw, _LANE)
    # Preferred: collapse the reduction axis entirely (wp VMEM-resident,
    # fetched once; no accumulator traffic, no per-k grid-step overhead).
    if _tile_usage_bytes(tb, chw_lane, dp, kp) <= budget:
        return tb, bp, chw_lane, chw_lane
    # Fallback: largest lane-aligned chunk whose double-buffered tiles fit;
    # pad C*H*W up to a multiple of it (zeros are exact for the contraction).
    tk = _LANE
    while (2 * tk <= _MAX_TK and 2 * tk < chw_lane
           and _tile_usage_bytes(tb, 2 * tk, dp, kp) <= budget):
        tk *= 2
    return tb, bp, tk, _round_up(chw, tk)


# ----------------------------------------------------------------------------
# Fused kernels: (pool-folded matmul) + bias + ReLU + head Linear
# ----------------------------------------------------------------------------
def _make_single_step_kernel(inv_hw):
    """grid = (batch_tiles,): whole fused forward in one step, no scratch."""
    def kernel(x_ref, wp_ref, be_ref, wh_ref, bh_ref, o_ref):
        # x_ref: (TB, KDIM) bf16, wp_ref: (KDIM, Dp) bf16 (constant index map,
        # fetched once across all batch tiles).
        acc = jnp.dot(x_ref[...], wp_ref[...],
                      preferred_element_type=jnp.float32)
        feat = jnp.maximum(acc * inv_hw + be_ref[...], 0.0)        # encoder ReLU
        out = jnp.dot(feat.astype(wh_ref.dtype), wh_ref[...],      # fused head
                      preferred_element_type=jnp.float32)
        o_ref[...] = (out + bh_ref[...]).astype(o_ref.dtype)
    return kernel


def _make_chunked_kernel(inv_hw):
    """grid = (batch_tiles, reduction_chunks): accumulate, finalize on last."""
    def kernel(x_ref, wp_ref, be_ref, wh_ref, bh_ref, o_ref, acc_ref):
        k = pl.program_id(1)

        @pl.when(k == 0)
        def _init():
            acc_ref[...] = jnp.zeros_like(acc_ref)

        # Sum-pool folded into the MXU contraction; 1/HW applied at finalize.
        acc_ref[...] += jnp.dot(x_ref[...], wp_ref[...],
                                preferred_element_type=jnp.float32)

        @pl.when(k == pl.num_programs(1) - 1)
        def _finalize():
            feat = jnp.maximum(acc_ref[...] * inv_hw + be_ref[...], 0.0)
            out = jnp.dot(feat.astype(wh_ref.dtype), wh_ref[...],
                          preferred_element_type=jnp.float32)
            o_ref[...] = (out + bh_ref[...]).astype(o_ref.dtype)
    return kernel


# ----------------------------------------------------------------------------
# One pallas_call per resolution group
# ----------------------------------------------------------------------------
def _encode_group_and_head(group, w_enc, wh_pad, be_pad, bh_pad):
    """group: list of (Bi, C, H, W) f32 crops of one resolution.
    Returns fused encoder+head outputs (Bg, Kp) f32 (lane padded)."""
    c = int(group[0].shape[1])
    hw = int(group[0].shape[2]) * int(group[0].shape[3])
    chw = c * hw
    bg = sum(int(g.shape[0]) for g in group)
    d = int(w_enc.shape[1])
    dp, kp = int(wh_pad.shape[0]), int(wh_pad.shape[1])

    budget = _vmem_budget_bytes()
    tb, bp, tk, kdim = _choose_tiles(bg, chw, dp, kp, budget)
    nb, nk = bp // tb, kdim // tk

    # bf16 cast fused into the concat (one HBM write of the activations);
    # batch padding folded into the same concat as a zero block.
    # TODO(synk): a PrefetchScalarGridSpec-driven per-crop gather would remove
    # this remaining concat copy entirely.
    parts = [g.reshape(g.shape[0], -1).astype(jnp.bfloat16) for g in group]
    if bp > bg:
        parts.append(jnp.zeros((bp - bg, chw), jnp.bfloat16))
    x2d = jnp.concatenate(parts, axis=0)                   # (bp, chw) bf16
    if kdim > chw:                                         # chunk/lane padding
        x2d = jnp.pad(x2d, ((0, 0), (0, kdim - chw)))

    # Sum-pool folded into the MXU weight: x_flat @ kron(w_enc, ones(HW)) ==
    # sum_pool(x) @ w_enc  (flatten order is c*HW + p, matching repeat axis 0).
    wp = jnp.repeat(w_enc.astype(jnp.bfloat16), hw, axis=0)         # (chw, D)
    wp_pad = jnp.zeros((kdim, dp), jnp.bfloat16).at[:chw, :d].set(wp)

    inv_hw = 1.0 / float(hw)
    flops = 2 * bp * kdim * dp + 2 * bp * dp * kp
    bytes_accessed = (bp * kdim * 2 + kdim * dp * 2 + dp * kp * 2
                      + (dp + kp) * 4 + bp * kp * 4)
    vmem_limit = int(min(budget,
                         max(2 * _tile_usage_bytes(tb, tk, dp, kp), 8 * 2**20)))
    cost = pl.CostEstimate(flops=flops, transcendentals=0,
                           bytes_accessed=bytes_accessed)

    # TODO(synk): mark the constant-index operands (wp/be/wh/bh) with
    # pipeline_mode=pl.Buffered(1) and add a kp-tiling grid axis for realistic
    # DINO head widths (kp ~ 65k) on v7x; both are no-ops at these sizes.
    if nk == 1:
        out = pl.pallas_call(
            _make_single_step_kernel(inv_hw),
            out_shape=jax.ShapeDtypeStruct((bp, kp), jnp.float32),
            grid=(nb,),
            in_specs=[
                pl.BlockSpec((tb, kdim), lambda i: (i, 0)),   # x tile
                pl.BlockSpec((kdim, dp), lambda i: (0, 0)),   # pool weight (resident)
                pl.BlockSpec((1, dp), lambda i: (0, 0)),      # encoder bias
                pl.BlockSpec((dp, kp), lambda i: (0, 0)),     # head weight
                pl.BlockSpec((1, kp), lambda i: (0, 0)),      # head bias
            ],
            out_specs=pl.BlockSpec((tb, kp), lambda i: (i, 0)),
            compiler_params=pltpu.CompilerParams(
                dimension_semantics=("parallel",),
                vmem_limit_bytes=vmem_limit),
            cost_estimate=cost,
        )(x2d, wp_pad, be_pad, wh_pad, bh_pad)
    else:
        out = pl.pallas_call(
            _make_chunked_kernel(inv_hw),
            out_shape=jax.ShapeDtypeStruct((bp, kp), jnp.float32),
            grid=(nb, nk),
            in_specs=[
                pl.BlockSpec((tb, tk), lambda i, k: (i, k)),   # x chunk
                pl.BlockSpec((tk, dp), lambda i, k: (k, 0)),   # pool weight chunk
                pl.BlockSpec((1, dp), lambda i, k: (0, 0)),    # encoder bias
                pl.BlockSpec((dp, kp), lambda i, k: (0, 0)),   # head weight
                pl.BlockSpec((1, kp), lambda i, k: (0, 0)),    # head bias
            ],
            out_specs=pl.BlockSpec((tb, kp), lambda i, k: (i, 0)),
            scratch_shapes=[pltpu.VMEM((tb, dp), jnp.float32)],
            compiler_params=pltpu.CompilerParams(
                dimension_semantics=("parallel", "arbitrary"),
                vmem_limit_bytes=vmem_limit),
            cost_estimate=cost,
        )(x2d, wp_pad, be_pad, wh_pad, bh_pad)

    return out[:bg]


# ----------------------------------------------------------------------------
# MultiCropWrapper.forward
# ----------------------------------------------------------------------------
def multi_crop_forward(x, w_enc, b_enc, w_head, b_head):
    """Replicates MultiCropWrapper.forward with a synthetic encoder/head."""
    if not isinstance(x, (list, tuple)):
        x = [x]

    # torch.cumsum(torch.unique_consecutive([inp.shape[-1]...], return_counts
    # =True)[1], 0): crop shapes are static, so grouping is trace-time Python.
    resolutions = [int(inp.shape[-1]) for inp in x]
    idx_crops = []
    for i in range(1, len(resolutions) + 1):
        if i == len(resolutions) or resolutions[i] != resolutions[i - 1]:
            idx_crops.append(i)

    D = int(w_enc.shape[1])
    K = int(w_head.shape[1])
    dp = _round_up(D, _LANE)          # lane-dense padded feature width
    kp = _round_up(K, _LANE)          # lane-dense padded head width

    be_pad = jnp.zeros((1, dp), jnp.float32).at[:, :D].set(
        b_enc.reshape(1, -1).astype(jnp.float32))
    bh_pad = jnp.zeros((1, kp), jnp.float32).at[:, :K].set(
        b_head.reshape(1, -1).astype(jnp.float32))
    wh_pad = jnp.zeros((dp, kp), jnp.bfloat16).at[:D, :K].set(
        w_head.astype(jnp.bfloat16))

    start_idx, outputs = 0, []
    for end_idx in idx_crops:
        outputs.append(_encode_group_and_head(
            x[start_idx:end_idx], w_enc, wh_pad, be_pad, bh_pad))
        start_idx = end_idx

    # The head is a per-sample Linear, so head(concat(features)) equals the
    # concatenation of the per-group fused head outputs (no feature HBM trip).
    out_pad = jnp.concatenate(outputs, axis=0) if len(outputs) > 1 else outputs[0]
    return out_pad[:, :K]                           # strip lane padding


# ----------------------------------------------------------------------------
# Demo / self-check
# ----------------------------------------------------------------------------
if __name__ == "__main__":
    key = jax.random.PRNGKey(0)
    k_x0, k_x1, k_x2, k_x3, k_we, k_be, k_wh, k_bh = jax.random.split(key, 8)

    B, C = 2, 4          # per-crop batch, channels
    D, K = 32, 16        # encoder embed dim, head output dim

    # Two "global" crops at 16x16 followed by two "local" crops at 8x8.
    x = [
        jax.random.normal(k_x0, (B, C, 16, 16), dtype=jnp.float32),
        jax.random.normal(k_x1, (B, C, 16, 16), dtype=jnp.float32),
        jax.random.normal(k_x2, (B, C, 8, 8), dtype=jnp.float32),
        jax.random.normal(k_x3, (B, C, 8, 8), dtype=jnp.float32),
    ]

    w_enc = jax.random.normal(k_we, (C, D), dtype=jnp.float32) * 0.1
    b_enc = jax.random.normal(k_be, (1, D), dtype=jnp.float32) * 0.01
    w_head = jax.random.normal(k_wh, (D, K), dtype=jnp.float32) * 0.1
    b_head = jax.random.normal(k_bh, (1, K), dtype=jnp.float32) * 0.01

    fwd = jax.jit(functools.partial(multi_crop_forward, x))
    out = jax.block_until_ready(fwd(w_enc, b_enc, w_head, b_head))

    group_slices = ((0, 2), (2, 4))   # same grouping as unique_consecutive

    # Reference 1: faithful to the kernel's bf16-operand / f32-accumulate
    # numerics (1/HW applied in f32 after the contraction).
    def ref_matched():
        outs = []
        for lo, hi in group_slices:
            g = jnp.concatenate(
                [xi.reshape(xi.shape[0], -1) for xi in x[lo:hi]], axis=0)
            hw = x[lo].shape[2] * x[lo].shape[3]
            wp = jnp.repeat(w_enc, hw, axis=0)
            acc = jnp.dot(g.astype(jnp.bfloat16), wp.astype(jnp.bfloat16),
                          preferred_element_type=jnp.float32)
            feat = jnp.maximum(acc * (1.0 / hw) + b_enc, 0.0)
            o = jnp.dot(feat.astype(jnp.bfloat16), w_head.astype(jnp.bfloat16),
                        preferred_element_type=jnp.float32) + b_head
            outs.append(o)
        return jnp.concatenate(outs, axis=0)

    # Reference 2: pure-f32 semantic reference (mean-pool -> Linear -> ReLU ->
    # head), i.e. the original module math; looser tol for bf16 MXU operands.
    def ref_semantic():
        feats = []
        for lo, hi in group_slices:
            g = jnp.concatenate(x[lo:hi], axis=0)
            pooled = jnp.mean(g.reshape(g.shape[0], C, -1), axis=-1)
            feats.append(jnp.maximum(pooled @ w_enc + b_enc, 0.0))
        feats = jnp.concatenate(feats, axis=0)
        return feats @ w_head + b_head

    assert out.shape == (4 * B, K), out.shape
    err_matched = float(jnp.max(jnp.abs(out - ref_matched())))
    err_semantic = float(jnp.max(jnp.abs(out - ref_semantic())))
    assert err_matched < 1e-4, err_matched
    assert err_semantic < 2e-3, err_semantic

    print("KERNEL_OK")
</pallas_src>

<mosaic_0001>
module attributes {stable_mosaic.version = 11 : i64} {
  func.func @kernel(%arg0: i32, %arg1: memref<16x1024xbf16, #tpu.memory_space<vmem>>, %arg2: memref<1024x128xbf16, #tpu.memory_space<vmem>>, %arg3: memref<1x128xf32, #tpu.memory_space<vmem>>, %arg4: memref<128x128xbf16, #tpu.memory_space<vmem>>, %arg5: memref<1x128xf32, #tpu.memory_space<vmem>>, %arg6: memref<16x128xf32, #tpu.memory_space<vmem>>) attributes {dimension_semantics = [#tpu.dimension_semantics<parallel>], iteration_bounds = array<i64: 1>, scalar_prefetch = 0 : i64, scratch_operands = 0 : i64, tpu.core_type = #tpu.core_type<tc>, window_params = [{transform_indices = @transform_0, window_bounds = array<i64: 16, 1024>}, {pipeline_mode = #tpu.pipeline_mode<synchronous>, transform_indices = @transform_1, window_bounds = array<i64: 1024, 128>}, {pipeline_mode = #tpu.pipeline_mode<synchronous>, transform_indices = @transform_2, window_bounds = array<i64: 1, 128>}, {pipeline_mode = #tpu.pipeline_mode<synchronous>, transform_indices = @transform_3, window_bounds = array<i64: 128, 128>}, {pipeline_mode = #tpu.pipeline_mode<synchronous>, transform_indices = @transform_4, window_bounds = array<i64: 1, 128>}, {transform_indices = @transform_5, window_bounds = array<i64: 16, 128>}]} {
    %c0 = arith.constant 0 : index
    %c0_0 = arith.constant 0 : index
    %0 = vector.load %arg1[%c0, %c0_0] : memref<16x1024xbf16, #tpu.memory_space<vmem>>, vector<16x1024xbf16>
    %c0_1 = arith.constant 0 : index
    %c0_2 = arith.constant 0 : index
    %1 = vector.load %arg2[%c0_1, %c0_2] : memref<1024x128xbf16, #tpu.memory_space<vmem>>, vector<1024x128xbf16>
    %cst = arith.constant dense<0.000000e+00> : vector<16x128xf32>
    %2 = tpu.matmul %0, %1, %cst {dimension_numbers = #tpu.dot_dimension_numbers<[1], [0], [0], [1], [0, 0, 1, 1], [], []>} : vector<16x1024xbf16>, vector<1024x128xbf16>, vector<16x128xf32> -> vector<16x128xf32>
    %cst_3 = arith.constant 3.906250e-03 : f32
    %3 = vector.broadcast %cst_3 : f32 to vector<16x128xf32>
    %4 = arith.mulf %2, %3 : vector<16x128xf32>
    %c0_4 = arith.constant 0 : index
    %c0_5 = arith.constant 0 : index
    %5 = vector.load %arg3[%c0_4, %c0_5] : memref<1x128xf32, #tpu.memory_space<vmem>>, vector<1x128xf32>
    %6 = vector.broadcast %5 : vector<1x128xf32> to vector<16x128xf32>
    %7 = arith.addf %4, %6 : vector<16x128xf32>
    %cst_6 = arith.constant 0.000000e+00 : f32
    %8 = vector.broadcast %cst_6 : f32 to vector<16x128xf32>
    %9 = arith.maximumf %7, %8 : vector<16x128xf32>
    %10 = arith.truncf %9 : vector<16x128xf32> to vector<16x128xbf16>
    %c0_7 = arith.constant 0 : index
    %c0_8 = arith.constant 0 : index
    %11 = vector.load %arg4[%c0_7, %c0_8] : memref<128x128xbf16, #tpu.memory_space<vmem>>, vector<128x128xbf16>
    %cst_9 = arith.constant dense<0.000000e+00> : vector<16x128xf32>
    %12 = tpu.matmul %10, %11, %cst_9 {dimension_numbers = #tpu.dot_dimension_numbers<[1], [0], [0], [1], [0, 0, 1, 1], [], []>} : vector<16x128xbf16>, vector<128x128xbf16>, vector<16x128xf32> -> vector<16x128xf32>
    %c0_10 = arith.constant 0 : index
    %c0_11 = arith.constant 0 : index
    %13 = vector.load %arg5[%c0_10, %c0_11] : memref<1x128xf32, #tpu.memory_space<vmem>>, vector<1x128xf32>
    %14 = vector.broadcast %13 : vector<1x128xf32> to vector<16x128xf32>
    %15 = arith.addf %12, %14 : vector<16x128xf32>
    %c0_12 = arith.constant 0 : index
    %c0_13 = arith.constant 0 : index
    %16 = vector.load %arg6[%c0_12, %c0_13] : memref<16x128xf32, #tpu.memory_space<vmem>>, vector<16x128xf32>
    tpu.vector_store %arg6[%c0_12, %c0_13], %15 {strides = array<i32>} : memref<16x128xf32, #tpu.memory_space<vmem>>, vector<16x128xf32>,
    return
  }
  func.func @transform_0(%arg0: i32) -> (i32, i32) {
    %c0_i32 = arith.constant 0 : i32
    %c0_i32_0 = arith.constant 0 : i32
    return %arg0, %c0_i32 : i32, i32
  }
  func.func @transform_1(%arg0: i32) -> (i32, i32) {
    %c0_i32 = arith.constant 0 : i32
    %c0_i32_0 = arith.constant 0 : i32
    %c0_i32_1 = arith.constant 0 : i32
    return %c0_i32, %c0_i32_0 : i32, i32
  }
  func.func @transform_2(%arg0: i32) -> (i32, i32) {
    %c0_i32 = arith.constant 0 : i32
    %c0_i32_0 = arith.constant 0 : i32
    %c0_i32_1 = arith.constant 0 : i32
    return %c0_i32, %c0_i32_0 : i32, i32
  }
  func.func @transform_3(%arg0: i32) -> (i32, i32) {
    %c0_i32 = arith.constant 0 : i32
    %c0_i32_0 = arith.constant 0 : i32
    %c0_i32_1 = arith.constant 0 : i32
    return %c0_i32, %c0_i32_0 : i32, i32
  }
  func.func @transform_4(%arg0: i32) -> (i32, i32) {
    %c0_i32 = arith.constant 0 : i32
    %c0_i32_0 = arith.constant 0 : i32
    %c0_i32_1 = arith.constant 0 : i32
    return %c0_i32, %c0_i32_0 : i32, i32
  }
  func.func @transform_5(%arg0: i32) -> (i32, i32) {
    %c0_i32 = arith.constant 0 : i32
    %c0_i32_0 = arith.constant 0 : i32
    return %arg0, %c0_i32 : i32, i32
  }
}

module attributes {stable_mosaic.version = 11 : i64} {
  func.func @kernel(%arg0: i32, %arg1: memref<16x256xbf16, #tpu.memory_space<vmem>>, %arg2: memref<256x128xbf16, #tpu.memory_space<vmem>>, %arg3: memref<1x128xf32, #tpu.memory_space<vmem>>, %arg4: memref<128x128xbf16, #tpu.memory_space<vmem>>, %arg5: memref<1x128xf32, #tpu.memory_space<vmem>>, %arg6: memref<16x128xf32, #tpu.memory_space<vmem>>) attributes {dimension_semantics = [#tpu.dimension_semantics<parallel>], iteration_bounds = array<i64: 1>, scalar_prefetch = 0 : i64, scratch_operands = 0 : i64, tpu.core_type = #tpu.core_type<tc>, window_params = [{transform_indices = @transform_0, window_bounds = array<i64: 16, 256>}, {pipeline_mode = #tpu.pipeline_mode<synchronous>, transform_indices = @transform_1, window_bounds = array<i64: 256, 128>}, {pipeline_mode = #tpu.pipeline_mode<synchronous>, transform_indices = @transform_2, window_bounds = array<i64: 1, 128>}, {pipeline_mode = #tpu.pipeline_mode<synchronous>, transform_indices = @transform_3, window_bounds = array<i64: 128, 128>}, {pipeline_mode = #tpu.pipeline_mode<synchronous>, transform_indices = @transform_4, window_bounds = array<i64: 1, 128>}, {transform_indices = @transform_5, window_bounds = array<i64: 16, 128>}]} {
    %c0 = arith.constant 0 : index
    %c0_0 = arith.constant 0 : index
    %0 = vector.load %arg1[%c0, %c0_0] : memref<16x256xbf16, #tpu.memory_space<vmem>>, vector<16x256xbf16>
    %c0_1 = arith.constant 0 : index
    %c0_2 = arith.constant 0 : index
    %1 = vector.load %arg2[%c0_1, %c0_2] : memref<256x128xbf16, #tpu.memory_space<vmem>>, vector<256x128xbf16>
    %cst = arith.constant dense<0.000000e+00> : vector<16x128xf32>
    %2 = tpu.matmul %0, %1, %cst {dimension_numbers = #tpu.dot_dimension_numbers<[1], [0], [0], [1], [0, 0, 1, 1], [], []>} : vector<16x256xbf16>, vector<256x128xbf16>, vector<16x128xf32> -> vector<16x128xf32>
    %cst_3 = arith.constant 1.562500e-02 : f32
    %3 = vector.broadcast %cst_3 : f32 to vector<16x128xf32>
    %4 = arith.mulf %2, %3 : vector<16x128xf32>
    %c0_4 = arith.constant 0 : index
    %c0_5 = arith.constant 0 : index
    %5 = vector.load %arg3[%c0_4, %c0_5] : memref<1x128xf32, #tpu.memory_space<vmem>>, vector<1x128xf32>
    %6 = vector.broadcast %5 : vector<1x128xf32> to vector<16x128xf32>
    %7 = arith.addf %4, %6 : vector<16x128xf32>
    %cst_6 = arith.constant 0.000000e+00 : f32
    %8 = vector.broadcast %cst_6 : f32 to vector<16x128xf32>
    %9 = arith.maximumf %7, %8 : vector<16x128xf32>
    %10 = arith.truncf %9 : vector<16x128xf32> to vector<16x128xbf16>
    %c0_7 = arith.constant 0 : index
    %c0_8 = arith.constant 0 : index
    %11 = vector.load %arg4[%c0_7, %c0_8] : memref<128x128xbf16, #tpu.memory_space<vmem>>, vector<128x128xbf16>
    %cst_9 = arith.constant dense<0.000000e+00> : vector<16x128xf32>
    %12 = tpu.matmul %10, %11, %cst_9 {dimension_numbers = #tpu.dot_dimension_numbers<[1], [0], [0], [1], [0, 0, 1, 1], [], []>} : vector<16x128xbf16>, vector<128x128xbf16>, vector<16x128xf32> -> vector<16x128xf32>
    %c0_10 = arith.constant 0 : index
    %c0_11 = arith.constant 0 : index
    %13 = vector.load %arg5[%c0_10, %c0_11] : memref<1x128xf32, #tpu.memory_space<vmem>>, vector<1x128xf32>
    %14 = vector.broadcast %13 : vector<1x128xf32> to vector<16x128xf32>
    %15 = arith.addf %12, %14 : vector<16x128xf32>
    %c0_12 = arith.constant 0 : index
    %c0_13 = arith.constant 0 : index
    %16 = vector.load %arg6[%c0_12, %c0_13] : memref<16x128xf32, #tpu.memory_space<vmem>>, vector<16x128xf32>
    tpu.vector_store %arg6[%c0_12, %c0_13], %15 {strides = array<i32>} : memref<16x128xf32, #tpu.memory_space<vmem>>, vector<16x128xf32>,
    return
  }
  func.func @transform_0(%arg0: i32) -> (i32, i32) {
    %c0_i32 = arith.constant 0 : i32
    %c0_i32_0 = arith.constant 0 : i32
    return %arg0, %c0_i32 : i32, i32
  }
  func.func @transform_1(%arg0: i32) -> (i32, i32) {
    %c0_i32 = arith.constant 0 : i32
    %c0_i32_0 = arith.constant 0 : i32
    %c0_i32_1 = arith.constant 0 : i32
    return %c0_i32, %c0_i32_0 : i32, i32
  }
  func.func @transform_2(%arg0: i32) -> (i32, i32) {
    %c0_i32 = arith.constant 0 : i32
    %c0_i32_0 = arith.constant 0 : i32
    %c0_i32_1 = arith.constant 0 : i32
    return %c0_i32, %c0_i32_0 : i32, i32
  }
  func.func @transform_3(%arg0: i32) -> (i32, i32) {
    %c0_i32 = arith.constant 0 : i32
    %c0_i32_0 = arith.constant 0 : i32
    %c0_i32_1 = arith.constant 0 : i32
    return %c0_i32, %c0_i32_0 : i32, i32
  }
  func.func @transform_4(%arg0: i32) -> (i32, i32) {
    %c0_i32 = arith.constant 0 : i32
    %c0_i32_0 = arith.constant 0 : i32
    %c0_i32_1 = arith.constant 0 : i32
    return %c0_i32, %c0_i32_0 : i32, i32
  }
  func.func @transform_5(%arg0: i32) -> (i32, i32) {
    %c0_i32 = arith.constant 0 : i32
    %c0_i32_0 = arith.constant 0 : i32
    return %arg0, %c0_i32 : i32, i32
  }
}

</mosaic_0001>

<bundles_post_ra>
// kernel: multi_crop_forward.3
= control target key start
LH: loop header
LB: loop body
LE: loop exit
PB: predicated region body
PF: predicated region fallthrough
CT: control target
= control target key end

     0   :  { %s545_s1 = inlined_call_operand.vmem [shape: bf16[256,128], index: 1, kind: input, shape index: {}]   ;;  %s546_s3 = inlined_call_operand.vmem [shape: bf16[128,128], index: 3, kind: input, shape index: {}]   ;;  %s547_s0 = inlined_call_operand.vmem [shape: bf16[16,256], index: 0, kind: input, shape index: {}]   ;;  %s548_s2 = inlined_call_operand.vmem [shape: f32[1,128], index: 2, kind: input, shape index: {}]   ;;  %s549_s4 = inlined_call_operand.vmem [shape: f32[1,128], index: 4, kind: input, shape index: {}]   ;;  %s550_s5 = inlined_call_operand.vmem [shape: f32[16,128], index: 5, kind: output, shape index: {}]  }
   0x1   :  { %v400_v0 = vld [vmem:[%s545_s1 + $0x38] sm:$0xff]  ;;  %v399_v2 = vld [vmem:[%s545_s1 + $0x30] sm:$0xff]  ;;  %v398_v4 = vld [vmem:[%s545_s1 + $0x28] sm:$0xff] }
   0x2   :  { %v408_v1 = vld [vmem:[%s545_s1 + $0x78] sm:$0xff]  ;;  %160 = vmatpush.bf16.msra.mxu0 %v400_v0  ;;  %v407_v3 = vld [vmem:[%s545_s1 + $0x70] sm:$0xff]  ;;  %v406_v5 = vld [vmem:[%s545_s1 + $0x68] sm:$0xff] }
   0x3   :  { %174 = vmatpush.bf16.msra.mxu1 %v408_v1  ;;  %v416_v6 = vld [vmem:[%s546_s3 + $0x38] sm:$0xff]  ;;  %v415_v7 = vld [vmem:[%s546_s3 + $0x30] sm:$0xff]  ;;  %v397_v8 = vld [vmem:[%s545_s1 + $0x20] sm:$0xff] }
   0x4   :  { %267 = vmatpush.bf16.msra.mxu2 %v416_v6  ;;  %v405_v9 = vld [vmem:[%s545_s1 + $0x60] sm:$0xff]  ;;  %v414_v10 = vld [vmem:[%s546_s3 + $0x28] sm:$0xff]  ;;  %v396_v11 = vld [vmem:[%s545_s1 + $0x18] sm:$0xff] }
   0x5   :  { %v404_v12 = vld [vmem:[%s545_s1 + $0x58] sm:$0xff]  ;;  %v395_v13 = vld [vmem:[%s545_s1 + $0x10] sm:$0xff]  ;;  %v394_v15 = vld [vmem:[%s545_s1 + $0x8] sm:$0xff] }
   0x6   :  { %161 = vmatpush.bf16.msra.mxu0 %v399_v2  ;;  %v403_v14 = vld [vmem:[%s545_s1 + $0x50] sm:$0xff]  ;;  %v402_v16 = vld [vmem:[%s545_s1 + $0x48] sm:$0xff]  ;;  %v393_v17 = vld [vmem:[%s545_s1] sm:$0xff] }
   0x7   :  { %175 = vmatpush.bf16.msra.mxu1 %v407_v3  ;;  %v401_v18 = vld [vmem:[%s545_s1 + $0x40] sm:$0xff]  ;;  %v392_v20 = vld [vmem:[%s547_s0 + $0x4] sm:$0xf0]  ;;  %v291_v22 = vld [vmem:[%s547_s0 + $0x8] sm:$0xf0] }
   0x8   :  { %268 = vmatpush.bf16.msra.mxu2 %v415_v7  ;;  %v289_v19 = vld [vmem:[%s547_s0] sm:$0xf]  ;;  %v391_v21 = vld [vmem:[%s547_s0 + $0x4] sm:$0xf]  ;;  %v412_v26 = vld [vmem:[%s546_s3 + $0x18] sm:$0xff] }
   0x9   :  { %v290_v23 = vor.u32 %v392_v20, %v289_v19  ;;  %v294_v24 = vor.u32 %v391_v21, %v291_v22  ;;  %v413_v25 = vld [vmem:[%s546_s3 + $0x20] sm:$0xff]  ;;  %v411_v27 = vld [vmem:[%s546_s3 + $0x10] sm:$0xff]  ;;  %v410_v28 = vld [vmem:[%s546_s3 + $0x8] sm:$0xff] }
   0xa   :  { %162 = vmatpush.bf16.msra.mxu0 %v398_v4  ;;  %v409_v29 = vld [vmem:[%s546_s3] sm:$0xff] }
   0xb   :  { %176 = vmatpush.bf16.msra.mxu1 %v406_v5  ;;  %v417_v34 = vld [vmem:[%s548_s2] ss:$0 sm:$0xff] }
   0xc   :  { %269 = vmatpush.bf16.msra.mxu2 %v414_v10  ;;  %v418_v44 = vld [vmem:[%s549_s4] ss:$0 sm:$0xff] }
   0xe   :  { %163 = vmatpush.bf16.msra.mxu0 %v397_v8 }
   0xf   :  { %177 = vmatpush.bf16.msra.mxu1 %v405_v9 }
  0x10   :  { %270 = vmatpush.bf16.msra.mxu2 %v413_v25 }
  0x12   :  { %164 = vmatpush.bf16.msra.mxu0 %v396_v11 }
  0x13   :  { %178 = vmatpush.bf16.msra.mxu1 %v404_v12 }
  0x14   :  { %271 = vmatpush.bf16.msra.mxu2 %v412_v26 }
  0x16   :  { %165 = vmatpush.bf16.msra.mxu0 %v395_v13 }
  0x17   :  { %179 = vmatpush.bf16.msra.mxu1 %v403_v14 }
  0x18   :  { %272 = vmatpush.bf16.msra.mxu2 %v411_v27 }
  0x1a   :  { %166 = vmatpush.bf16.msra.mxu0 %v394_v15 }
  0x1b   :  { %180 = vmatpush.bf16.msra.mxu1 %v402_v16 }
  0x1c   :  { %273 = vmatpush.bf16.msra.mxu2 %v410_v28 }
  0x1e   :  { %167 = vmatpush.bf16.msra.mxu0 %v393_v17 }
  0x1f   :  { %181 = vmatpush.bf16.msra.mxu1 %v401_v18 }
  0x20   :  { %274 = vmatpush.bf16.msra.mxu2 %v409_v29 }
  0x21   :  { %168 = vmatmul.bf16.vlgmr.msra.gmra.mxu0 %v290_v23 }
  0x22   :  { %182 = vmatmul.bf16.vlgmr.msra.gmra.mxu1 %v294_v24 }
  0x9e   :  { %v169_v30 = vpop.f32.mrf.mxu0 }
  0x9f   :  { %v183_v31 = vpop.f32.mrf.mxu1 }
  0xa0   :  { %v184_v32 = vadd.f32 %v183_v31, %v169_v30 }
  0xa2   :  { %v188_v33 = vmul.f32 0.015625, %v184_v32 }
  0xa4   :  { %v194_v38 = vadd.f32 %v417_v34, %v188_v33 }
  0xa6   :  { %v171_v35 = vpop.f32.mrf.mxu0  ;;  %v196_v41 = vmax.f32 %v194_v38, 0.0 }
  0xa7   :  { %v185_v36 = vpop.f32.mrf.mxu1 }
  0xa8   :  { %v186_v37 = vadd.f32 %v185_v36, %v171_v35 }
  0xaa   :  { %v189_v39 = vmul.f32 0.015625, %v186_v37 }
  0xac   :  { %v195_v40 = vadd.f32 %v417_v34, %v189_v39 }
  0xae   :  { %v197_v42 = vmax.f32 %v195_v40, 0.0 }
  0xb0   :  { %v198_v43 = vpack.c.bf16 %v197_v42, %v196_v41 }
  0xb2   :  { %275 = vmatmul.bf16.vlgmr.msra.gmra.mxu2 %v198_v43 }
 0x135   :  { %v276_v45 = vpop.f32.mrf.mxu2 }
 0x136   :  { %v277_v46 = vadd.f32 %v418_v44, %v276_v45 }
 0x138   :  { %281 = vst [vmem:[%s550_s5] sm:$0xff] %v277_v46 }
 0x13d   :  { %v278_v47 = vpop.f32.mrf.mxu2 }
 0x13e   :  { %v279_v48 = vadd.f32 %v418_v44, %v278_v47 }
 0x140   :  { %282 = vst [vmem:[%s550_s5 + $0x8] sm:$0xff] %v279_v48 }

// kernel: multi_crop_forward.2
= control target key start
LH: loop header
LB: loop body
LE: loop exit
PB: predicated region body
PF: predicated region fallthrough
CT: control target
= control target key end

     0   :  { %s1499_s1 = inlined_call_operand.vmem [shape: bf16[1024,128], index: 1, kind: input, shape index: {}]   ;;  %s1500_s0 = inlined_call_operand.vmem [shape: bf16[16,1024], index: 0, kind: input, shape index: {}]   ;;  %s1501_s2 = inlined_call_operand.vmem [shape: f32[1,128], index: 2, kind: input, shape index: {}]   ;;  %s1502_s4 = inlined_call_operand.vmem [shape: f32[1,128], index: 4, kind: input, shape index: {}]   ;;  %s1503_s3 = inlined_call_operand.vmem [shape: bf16[128,128], index: 3, kind: input, shape index: {}]   ;;  %s1504_s5 = inlined_call_operand.vmem [shape: f32[16,128], index: 5, kind: output, shape index: {}]  }
   0x1   :  { %v1126_v0 = vld [vmem:[%s1499_s1 + $0x38] sm:$0xff]  ;;  %v1125_v4 = vld [vmem:[%s1499_s1 + $0x30] sm:$0xff]  ;;  %v1124_v8 = vld [vmem:[%s1499_s1 + $0x28] sm:$0xff] }
   0x2   :  { %v1134_v1 = vld [vmem:[%s1499_s1 + $0x78] sm:$0xff]  ;;  %580 = vmatpush.bf16.msra.mxu0 %v1126_v0  ;;  %v1133_v5 = vld [vmem:[%s1499_s1 + $0x70] sm:$0xff]  ;;  %v1132_v9 = vld [vmem:[%s1499_s1 + $0x68] sm:$0xff] }
   0x3   :  { %v1142_v2 = vld [vmem:[%s1499_s1 + $0xb8] sm:$0xff]  ;;  %594 = vmatpush.bf16.msra.mxu1 %v1134_v1  ;;  %v1141_v6 = vld [vmem:[%s1499_s1 + $0xb0] sm:$0xff]  ;;  %v1140_v10 = vld [vmem:[%s1499_s1 + $0xa8] sm:$0xff] }
   0x4   :  { %v1150_v3 = vld [vmem:[%s1499_s1 + $0xf8] sm:$0xff]  ;;  %608 = vmatpush.bf16.msra.mxu2 %v1142_v2  ;;  %v1149_v7 = vld [vmem:[%s1499_s1 + $0xf0] sm:$0xff]  ;;  %v1148_v11 = vld [vmem:[%s1499_s1 + $0xe8] sm:$0xff] }
   0x5   :  { %622 = vmatpush.bf16.msra.mxu3 %v1150_v3  ;;  %v1123_v12 = vld [vmem:[%s1499_s1 + $0x20] sm:$0xff]  ;;  %v1122_v16 = vld [vmem:[%s1499_s1 + $0x18] sm:$0xff]  ;;  %v1121_v20 = vld [vmem:[%s1499_s1 + $0x10] sm:$0xff] }
   0x6   :  { %581 = vmatpush.bf16.msra.mxu0 %v1125_v4  ;;  %v1131_v13 = vld [vmem:[%s1499_s1 + $0x60] sm:$0xff]  ;;  %v1130_v17 = vld [vmem:[%s1499_s1 + $0x58] sm:$0xff]  ;;  %v1129_v21 = vld [vmem:[%s1499_s1 + $0x50] sm:$0xff] }
   0x7   :  { %595 = vmatpush.bf16.msra.mxu1 %v1133_v5  ;;  %v1139_v14 = vld [vmem:[%s1499_s1 + $0xa0] sm:$0xff]  ;;  %v1138_v18 = vld [vmem:[%s1499_s1 + $0x98] sm:$0xff]  ;;  %v1137_v22 = vld [vmem:[%s1499_s1 + $0x90] sm:$0xff] }
   0x8   :  { %609 = vmatpush.bf16.msra.mxu2 %v1141_v6  ;;  %v1147_v15 = vld [vmem:[%s1499_s1 + $0xe0] sm:$0xff]  ;;  %v1146_v19 = vld [vmem:[%s1499_s1 + $0xd8] sm:$0xff]  ;;  %v1145_v23 = vld [vmem:[%s1499_s1 + $0xd0] sm:$0xff] }
   0x9   :  { %623 = vmatpush.bf16.msra.mxu3 %v1149_v7  ;;  %v1120_v24 = vld [vmem:[%s1499_s1 + $0x8] sm:$0xff]  ;;  %v1119_v28 = vld [vmem:[%s1499_s1] sm:$0xff]  ;;  %v1158_v32 = vld [vmem:[%s1499_s1 + $0x138] sm:$0xff] }
   0xa   :  { %582 = vmatpush.bf16.msra.mxu0 %v1124_v8  ;;  %v1128_v25 = vld [vmem:[%s1499_s1 + $0x48] sm:$0xff]  ;;  %v1127_v29 = vld [vmem:[%s1499_s1 + $0x40] sm:$0xff]  ;;  %v1166_v33 = vld [vmem:[%s1499_s1 + $0x178] sm:$0xff] }
   0xb   :  { %596 = vmatpush.bf16.msra.mxu1 %v1132_v9  ;;  %v1136_v26 = vld [vmem:[%s1499_s1 + $0x88] sm:$0xff]  ;;  %v1135_v30 = vld [vmem:[%s1499_s1 + $0x80] sm:$0xff]  ;;  %v1174_v42 = vld [vmem:[%s1499_s1 + $0x1b8] sm:$0xff] }
   0xc   :  { %610 = vmatpush.bf16.msra.mxu2 %v1140_v10  ;;  %v1144_v27 = vld [vmem:[%s1499_s1 + $0xc8] sm:$0xff]  ;;  %v1143_v31 = vld [vmem:[%s1499_s1 + $0xc0] sm:$0xff]  ;;  %v1182_v43 = vld [vmem:[%s1499_s1 + $0x1f8] sm:$0xff] }
   0xd   :  { %624 = vmatpush.bf16.msra.mxu3 %v1148_v11  ;;  %v801_v34 = vld [vmem:[%s1500_s0 + $0x8] sm:$0xf]  ;;  %v1112_v36 = vld [vmem:[%s1500_s0 + $0xc] sm:$0xf]  ;;  %v793_v38 = vld [vmem:[%s1500_s0] sm:$0xf] }
   0xe   :  { %583 = vmatpush.bf16.msra.mxu0 %v1123_v12  ;;  %v1116_v35 = vld [vmem:[%s1500_s0 + $0x24] sm:$0xf0]  ;;  %v803_v37 = vld [vmem:[%s1500_s0 + $0x28] sm:$0xf0]  ;;  %v1115_v39 = vld [vmem:[%s1500_s0 + $0x1c] sm:$0xf0] }
   0xf   :  { %597 = vmatpush.bf16.msra.mxu1 %v1131_v13  ;;  %v1111_v40 = vld [vmem:[%s1500_s0 + $0x4] sm:$0xf]  ;;  %v802_v44 = vor.u32 %v1116_v35, %v801_v34  ;;  %v806_v45 = vor.u32 %v1112_v36, %v803_v37  ;;  %v794_v46 = vor.u32 %v1115_v39, %v793_v38  ;;  %v1157_v48 = vld [vmem:[%s1499_s1 + $0x130] sm:$0xff]  ;;  %v1156_v52 = vld [vmem:[%s1499_s1 + $0x128] sm:$0xff] }
  0x10   :  { %611 = vmatpush.bf16.msra.mxu2 %v1139_v14  ;;  %v795_v41 = vld [vmem:[%s1500_s0 + $0x20] sm:$0xf0]  ;;  %v1165_v49 = vld [vmem:[%s1499_s1 + $0x170] sm:$0xff]  ;;  %v1164_v53 = vld [vmem:[%s1499_s1 + $0x168] sm:$0xff] }
  0x11   :  { %625 = vmatpush.bf16.msra.mxu3 %v1147_v15  ;;  %v798_v47 = vor.u32 %v1111_v40, %v795_v41  ;;  %v1173_v50 = vld [vmem:[%s1499_s1 + $0x1b0] sm:$0xff]  ;;  %v1172_v54 = vld [vmem:[%s1499_s1 + $0x1a8] sm:$0xff]  ;;  %v1155_v56 = vld [vmem:[%s1499_s1 + $0x120] sm:$0xff] }
  0x12   :  { %584 = vmatpush.bf16.msra.mxu0 %v1122_v16  ;;  %v1181_v51 = vld [vmem:[%s1499_s1 + $0x1f0] sm:$0xff]  ;;  %v1180_v55 = vld [vmem:[%s1499_s1 + $0x1e8] sm:$0xff]  ;;  %v1163_v57 = vld [vmem:[%s1499_s1 + $0x160] sm:$0xff] }
  0x13   :  { %598 = vmatpush.bf16.msra.mxu1 %v1130_v17  ;;  %v1171_v58 = vld [vmem:[%s1499_s1 + $0x1a0] sm:$0xff]  ;;  %v1154_v60 = vld [vmem:[%s1499_s1 + $0x118] sm:$0xff]  ;;  %v1153_v0 = vld [vmem:[%s1499_s1 + $0x110] sm:$0xff] }
  0x14   :  { %612 = vmatpush.bf16.msra.mxu2 %v1138_v18  ;;  %v1179_v59 = vld [vmem:[%s1499_s1 + $0x1e0] sm:$0xff]  ;;  %v1162_v61 = vld [vmem:[%s1499_s1 + $0x158] sm:$0xff]  ;;  %v1161_v1 = vld [vmem:[%s1499_s1 + $0x150] sm:$0xff] }
  0x15   :  { %626 = vmatpush.bf16.msra.mxu3 %v1146_v19  ;;  %v1170_v62 = vld [vmem:[%s1499_s1 + $0x198] sm:$0xff]  ;;  %v1169_v2 = vld [vmem:[%s1499_s1 + $0x190] sm:$0xff]  ;;  %v1152_v4 = vld [vmem:[%s1499_s1 + $0x108] sm:$0xff] }
  0x16   :  { %585 = vmatpush.bf16.msra.mxu0 %v1121_v20  ;;  %v1178_v63 = vld [vmem:[%s1499_s1 + $0x1d8] sm:$0xff]  ;;  %v1177_v3 = vld [vmem:[%s1499_s1 + $0x1d0] sm:$0xff]  ;;  %v1160_v5 = vld [vmem:[%s1499_s1 + $0x148] sm:$0xff] }
  0x17   :  { %599 = vmatpush.bf16.msra.mxu1 %v1129_v21  ;;  %v1168_v6 = vld [vmem:[%s1499_s1 + $0x188] sm:$0xff]  ;;  %v1151_v8 = vld [vmem:[%s1499_s1 + $0x100] sm:$0xff]  ;;  %v809_v12 = vld [vmem:[%s1500_s0 + $0x10] sm:$0xf] }
  0x18   :  { %613 = vmatpush.bf16.msra.mxu2 %v1137_v22  ;;  %v1176_v7 = vld [vmem:[%s1499_s1 + $0x1c8] sm:$0xff]  ;;  %v1159_v9 = vld [vmem:[%s1499_s1 + $0x140] sm:$0xff]  ;;  %v1117_v13 = vld [vmem:[%s1500_s0 + $0x2c] sm:$0xf0] }
  0x19   :  { %627 = vmatpush.bf16.msra.mxu3 %v1145_v23  ;;  %v1167_v10 = vld [vmem:[%s1499_s1 + $0x180] sm:$0xff]  ;;  %v1113_v14 = vld [vmem:[%s1500_s0 + $0x14] sm:$0xf]  ;;  %v817_v16 = vld [vmem:[%s1500_s0 + $0x18] sm:$0xf]  ;;  %v810_v20 = vor.u32 %v1117_v13, %v809_v12 }
  0x1a   :  { %586 = vmatpush.bf16.msra.mxu0 %v1120_v24  ;;  %v1175_v11 = vld [vmem:[%s1499_s1 + $0x1c0] sm:$0xff]  ;;  %v811_v15 = vld [vmem:[%s1500_s0 + $0x30] sm:$0xf0]  ;;  %v1118_v17 = vld [vmem:[%s1500_s0 + $0x34] sm:$0xf0] }
  0x1b   :  { %600 = vmatpush.bf16.msra.mxu1 %v1128_v25  ;;  %v1114_v18 = vld [vmem:[%s1500_s0 + $0x1c] sm:$0xf]  ;;  %v814_v21 = vor.u32 %v1113_v14, %v811_v15  ;;  %v818_v22 = vor.u32 %v1118_v17, %v817_v16  ;;  %v1189_v25 = vld [vmem:[%s1503_s3 + $0x30] sm:$0xff]  ;;  %v1183_v35 = vld [vmem:[%s1503_s3] sm:$0xff] }
  0x1c   :  { %614 = vmatpush.bf16.msra.mxu2 %v1136_v26  ;;  %v819_v19 = vld [vmem:[%s1500_s0 + $0x38] sm:$0xf0]  ;;  %v1188_v26 = vld [vmem:[%s1503_s3 + $0x28] sm:$0xff] }
  0x1d   :  { %628 = vmatpush.bf16.msra.mxu3 %v1144_v27  ;;  %v822_v23 = vor.u32 %v1114_v18, %v819_v19  ;;  %v1190_v24 = vld [vmem:[%s1503_s3 + $0x38] sm:$0xff]  ;;  %v1187_v27 = vld [vmem:[%s1503_s3 + $0x20] sm:$0xff] }
  0x1e   :  { %587 = vmatpush.bf16.msra.mxu0 %v1119_v28  ;;  %v1186_v28 = vld [vmem:[%s1503_s3 + $0x18] sm:$0xff] }
  0x1f   :  { %601 = vmatpush.bf16.msra.mxu1 %v1127_v29 }
  0x20   :  { %615 = vmatpush.bf16.msra.mxu2 %v1135_v30  ;;  %v1185_v30 = vld [vmem:[%s1503_s3 + $0x10] sm:$0xff] }
  0x21   :  { %629 = vmatpush.bf16.msra.mxu3 %v1143_v31  ;;  %588 = vmatmul.bf16.vlgmr.msra.gmra.mxu0 %v794_v46 }
  0x22   :  { %636 = vmatpush.bf16.msrb.mxu0 %v1158_v32  ;;  %602 = vmatmul.bf16.vlgmr.msra.gmra.mxu1 %v798_v47  ;;  %v1184_v32 = vld [vmem:[%s1503_s3 + $0x8] sm:$0xff] }
  0x23   :  { %650 = vmatpush.bf16.msrb.mxu1 %v1166_v33  ;;  %616 = vmatmul.bf16.vlgmr.msra.gmra.mxu2 %v802_v44 }
  0x24   :  { %664 = vmatpush.bf16.msrb.mxu2 %v1174_v42  ;;  %630 = vmatmul.bf16.vlgmr.msra.gmra.mxu3 %v806_v45 }
  0x25   :  { %678 = vmatpush.bf16.msrb.mxu3 %v1182_v43 }
  0x26   :  { %637 = vmatpush.bf16.msrb.mxu0 %v1157_v48 }
  0x27   :  { %651 = vmatpush.bf16.msrb.mxu1 %v1165_v49 }
  0x28   :  { %665 = vmatpush.bf16.msrb.mxu2 %v1173_v50 }
  0x29   :  { %679 = vmatpush.bf16.msrb.mxu3 %v1181_v51 }
  0x2a   :  { %638 = vmatpush.bf16.msrb.mxu0 %v1156_v52 }
  0x2b   :  { %652 = vmatpush.bf16.msrb.mxu1 %v1164_v53 }
  0x2c   :  { %666 = vmatpush.bf16.msrb.mxu2 %v1172_v54 }
  0x2d   :  { %680 = vmatpush.bf16.msrb.mxu3 %v1180_v55 }
  0x2e   :  { %639 = vmatpush.bf16.msrb.mxu0 %v1155_v56 }
  0x2f   :  { %653 = vmatpush.bf16.msrb.mxu1 %v1163_v57 }
  0x30   :  { %667 = vmatpush.bf16.msrb.mxu2 %v1171_v58 }
  0x31   :  { %681 = vmatpush.bf16.msrb.mxu3 %v1179_v59 }
  0x32   :  { %640 = vmatpush.bf16.msrb.mxu0 %v1154_v60  ;;  %v1191_v60 = vld [vmem:[%s1501_s2] ss:$0 sm:$0xff] }
  0x33   :  { %654 = vmatpush.bf16.msrb.mxu1 %v1162_v61 }
  0x34   :  { %668 = vmatpush.bf16.msrb.mxu2 %v1170_v62 }
  0x35   :  { %682 = vmatpush.bf16.msrb.mxu3 %v1178_v63 }
  0x36   :  { %641 = vmatpush.bf16.msrb.mxu0 %v1153_v0 }
  0x37   :  { %655 = vmatpush.bf16.msrb.mxu1 %v1161_v1 }
  0x38   :  { %669 = vmatpush.bf16.msrb.mxu2 %v1169_v2 }
  0x39   :  { %683 = vmatpush.bf16.msrb.mxu3 %v1177_v3 }
  0x3a   :  { %642 = vmatpush.bf16.msrb.mxu0 %v1152_v4 }
  0x3b   :  { %656 = vmatpush.bf16.msrb.mxu1 %v1160_v5 }
  0x3c   :  { %670 = vmatpush.bf16.msrb.mxu2 %v1168_v6  ;;  %v1192_v6 = vld [vmem:[%s1502_s4] ss:$0 sm:$0xff] }
  0x3d   :  { %684 = vmatpush.bf16.msrb.mxu3 %v1176_v7 }
  0x3e   :  { %643 = vmatpush.bf16.msrb.mxu0 %v1151_v8 }
  0x3f   :  { %657 = vmatpush.bf16.msrb.mxu1 %v1159_v9 }
  0x40   :  { %671 = vmatpush.bf16.msrb.mxu2 %v1167_v10 }
  0x41   :  { %685 = vmatpush.bf16.msrb.mxu3 %v1175_v11  ;;  %644 = vmatmul.bf16.vlgmr.msrb.gmra.mxu0 %v810_v20 }
  0x42   :  { %658 = vmatmul.bf16.vlgmr.msrb.gmra.mxu1 %v814_v21  ;;  %771 = vmatpush.bf16.msra.mxu0 %v1190_v24 }
  0x43   :  { %672 = vmatmul.bf16.vlgmr.msrb.gmra.mxu2 %v818_v22 }
  0x44   :  { %686 = vmatmul.bf16.vlgmr.msrb.gmra.mxu3 %v822_v23 }
  0x46   :  { %772 = vmatpush.bf16.msra.mxu0 %v1189_v25 }
  0x4a   :  { %773 = vmatpush.bf16.msra.mxu0 %v1188_v26 }
  0x4e   :  { %774 = vmatpush.bf16.msra.mxu0 %v1187_v27 }
  0x52   :  { %775 = vmatpush.bf16.msra.mxu0 %v1186_v28 }
  0x56   :  { %776 = vmatpush.bf16.msra.mxu0 %v1185_v30 }
  0x5a   :  { %777 = vmatpush.bf16.msra.mxu0 %v1184_v32 }
  0x5e   :  { %778 = vmatpush.bf16.msra.mxu0 %v1183_v35 }
  0x9e   :  { %v589_v29 = vpop.f32.mrf.mxu0 }
  0x9f   :  { %v603_v31 = vpop.f32.mrf.mxu1 }
  0xa0   :  { %v604_v36 = vadd.f32 %v603_v31, %v589_v29 }
  0xa6   :  { %v617_v33 = vpop.f32.mrf.mxu2  ;;  %v591_v37 = vpop.f32.mrf.mxu0 }
  0xa7   :  { %v631_v34 = vpop.f32.mrf.mxu3  ;;  %v605_v38 = vpop.f32.mrf.mxu1  ;;  %v618_v39 = vadd.f32 %v617_v33, %v604_v36 }
  0xa8   :  { %v606_v43 = vadd.f32 %v605_v38, %v591_v37 }
  0xa9   :  { %v632_v42 = vadd.f32 %v631_v34, %v618_v39 }
  0xae   :  { %v619_v40 = vpop.f32.mrf.mxu2 }
  0xaf   :  { %v633_v41 = vpop.f32.mrf.mxu3  ;;  %v620_v47 = vadd.f32 %v619_v40, %v606_v43 }
  0xb1   :  { %v634_v51 = vadd.f32 %v633_v41, %v620_v47 }
  0xbe   :  { %v645_v44 = vpop.f32.mrf.mxu0 }
  0xbf   :  { %v646_v45 = vadd.f32 %v645_v44, %v632_v42  ;;  %v659_v46 = vpop.f32.mrf.mxu1 }
  0xc1   :  { %v660_v48 = vadd.f32 %v659_v46, %v646_v45 }
  0xc6   :  { %v673_v49 = vpop.f32.mrf.mxu2  ;;  %v647_v53 = vpop.f32.mrf.mxu0 }
  0xc7   :  { %v687_v50 = vpop.f32.mrf.mxu3  ;;  %v674_v52 = vadd.f32 %v673_v49, %v660_v48  ;;  %v648_v54 = vadd.f32 %v647_v53, %v634_v51  ;;  %v661_v56 = vpop.f32.mrf.mxu1 }
  0xc9   :  { %v688_v55 = vadd.f32 %v687_v50, %v674_v52  ;;  %v662_v57 = vadd.f32 %v661_v56, %v648_v54 }
  0xcb   :  { %v692_v59 = vmul.f32 0.00390625, %v688_v55 }
  0xcd   :  { %v698_v0 = vadd.f32 %v1191_v60, %v692_v59 }
  0xce   :  { %v675_v58 = vpop.f32.mrf.mxu2 }
  0xcf   :  { %v676_v61 = vadd.f32 %v675_v58, %v662_v57  ;;  %v689_v62 = vpop.f32.mrf.mxu3  ;;  %v700_v3 = vmax.f32 %v698_v0, 0.0 }
  0xd1   :  { %v690_v63 = vadd.f32 %v689_v62, %v676_v61 }
  0xd3   :  { %v693_v1 = vmul.f32 0.00390625, %v690_v63 }
  0xd5   :  { %v699_v2 = vadd.f32 %v1191_v60, %v693_v1 }
  0xd7   :  { %v701_v4 = vmax.f32 %v699_v2, 0.0 }
  0xd9   :  { %v702_v5 = vpack.c.bf16 %v701_v4, %v700_v3 }
  0xdb   :  { %779 = vmatmul.bf16.vlgmr.msra.gmra.mxu0 %v702_v5 }
 0x158   :  { %v780_v7 = vpop.f32.mrf.mxu0 }
 0x159   :  { %v781_v8 = vadd.f32 %v1192_v6, %v780_v7 }
 0x15b   :  { %785 = vst [vmem:[%s1504_s5] sm:$0xff] %v781_v8 }
 0x160   :  { %v782_v9 = vpop.f32.mrf.mxu0 }
 0x161   :  { %v783_v10 = vadd.f32 %v1192_v6, %v782_v9 }
 0x163   :  { %786 = vst [vmem:[%s1504_s5 + $0x8] sm:$0xff] %v783_v10 }

</bundles_post_ra>
